<compile_context>
chip_gen: v5e
topology: v5e:2x2
jax: 0.10.0
libtpu: 0.0.40
codegen_flags: <defaults>
</compile_context>

<pallas_src>
import functools

import numpy as np
import jax
import jax.numpy as jnp
from jax import lax
from jax.experimental import pallas as pl
from jax.experimental.pallas import tpu as pltpu


def _round_up(x, m):
    return ((x + m - 1) // m) * m


# ---------------------------------------------------------------------------
# Kernel A (default): single column pass per row tile.  z_j is resident in
# VMEM; plain logsumexp over the full [TM, Lp] f32 S row tile.
# ---------------------------------------------------------------------------
def _uu_single_pass_kernel(l_true, padded, zi_ref, zj_ref, out_ref):
    i = pl.program_id(0)
    TM = zi_ref.shape[0]

    zi = zi_ref[...]                                         # [TM, D]  bf16
    zj = zj_ref[...]                                         # [Lp, D]  bf16 (resident)

    # S = z_i @ z_j.T  ('ij,kj->ik'): contract the last dim of both operands on
    # the MXU, f32 accumulation; no transpose, no D padding.
    s = lax.dot_general(zi, zj,
                        dimension_numbers=(((1,), (1,)), ((), ())),
                        preferred_element_type=jnp.float32)  # [TM, Lp] f32

    if padded:
        # Padded z_j rows (duplicates of index 0) must not enter the denominator.
        col = lax.broadcasted_iota(jnp.int32, s.shape, 1)
        s = jnp.where(col < l_true, s, jnp.float32(-1e30))

    # positives = diag(S): row-wise dot of z_i with the row-aligned slice of the
    # resident z_j block (O(TM*D); no [TM,Lp] diag mask, no duplicate input).
    row0 = pl.multiple_of(i * TM, 8)
    zj_rows = zj_ref[pl.ds(row0, TM), :]                     # [TM, D]
    pos = jnp.sum(zi.astype(jnp.float32) * zj_rows.astype(jnp.float32),
                  axis=1, keepdims=True)                     # [TM, 1]

    m = jnp.max(s, axis=1, keepdims=True)
    sumexp = jnp.sum(jnp.exp(s - m), axis=1, keepdims=True)
    per_row = m + jnp.log(sumexp) - pos                      # [TM, 1]

    if padded:
        row = i * TM + lax.broadcasted_iota(jnp.int32, per_row.shape, 0)
        per_row = jnp.where(row < l_true, per_row, jnp.float32(0.0))
    out_ref[...] = per_row


# ---------------------------------------------------------------------------
# Kernel B (fallback for very large L): flash-style online logsumexp over
# streamed z_j column tiles.  Requires TM == TK (diag of row tile i lives in
# column tile k == i).
# ---------------------------------------------------------------------------
def _uu_flash_kernel(l_true, padded, zi_ref, zjc_ref, out_ref,
                     m_sc, l_sc, pos_sc):
    i = pl.program_id(0)
    k = pl.program_id(1)
    TM = zi_ref.shape[0]
    TK = zjc_ref.shape[0]

    @pl.when(k == 0)
    def _():
        m_sc[...] = jnp.full_like(m_sc, -jnp.inf)
        l_sc[...] = jnp.zeros_like(l_sc)
        pos_sc[...] = jnp.zeros_like(pos_sc)

    zi = zi_ref[...]                                         # [TM, D] bf16
    zjc = zjc_ref[...]                                       # [TK, D] bf16

    s = lax.dot_general(zi, zjc,
                        dimension_numbers=(((1,), (1,)), ((), ())),
                        preferred_element_type=jnp.float32)  # [TM, TK] f32
    if padded:
        col = k * TK + lax.broadcasted_iota(jnp.int32, s.shape, 1)
        s = jnp.where(col < l_true, s, jnp.float32(-1e30))

    # Online logsumexp update.
    m_prev = m_sc[...]
    m_new = jnp.maximum(m_prev, jnp.max(s, axis=1, keepdims=True))
    alpha = jnp.exp(m_prev - m_new)
    l_sc[...] = alpha * l_sc[...] + jnp.sum(jnp.exp(s - m_new),
                                            axis=1, keepdims=True)
    m_sc[...] = m_new

    # positives = diag(S): row-dot against the diagonal column tile (k == i).
    @pl.when(k == i)
    def _():
        pos_sc[...] = jnp.sum(zi.astype(jnp.float32) * zjc.astype(jnp.float32),
                              axis=1, keepdims=True)

    @pl.when(k == pl.num_programs(1) - 1)
    def _():
        per_row = m_sc[...] + jnp.log(l_sc[...]) - pos_sc[...]
        if padded:
            row = i * TM + lax.broadcasted_iota(jnp.int32, per_row.shape, 0)
            per_row = jnp.where(row < l_true, per_row, jnp.float32(0.0))
        out_ref[...] = per_row


def u_u_cts_loss_pallas(source_user_emb, target_user_emb, overlap_user_id, *,
                        single_pass_budget_bytes=20 * 1024 * 1024,
                        force_flash=False):
    """CrossEntropy([diag(S) | off-diag(S)], 0) for S = z_i @ z_j.T, where
    z_i/z_j are the overlap-user rows of the source/target user embeddings.
    Returns the unscaled scalar loss (mean over the L overlap users)."""
    overlap = np.asarray(overlap_user_id)
    L = int(overlap.shape[0])
    if L == 0:
        # TODO(synk): PyTorch CrossEntropyLoss on an empty batch yields NaN;
        # 0.0 is the safer convention here (documented deviation).
        return jnp.float32(0.0)
    D = int(source_user_emb.shape[1])

    # ---- tiling plan -------------------------------------------------------
    # >= 2 row tiles once L > 256 so both v7x TensorCores get work; small L
    # collapses to one sublane-aligned tile (call is overhead-bound anyway).
    TM_pref = 256 if L > 256 else _round_up(L, 8)

    def _single_pass_plan(tm):
        lp = _round_up(L, tm)
        # resident z_j (x2 buffers) + z_i tiles (x2) + S tile & exp temp (f32)
        need = (2 * lp * D * 2) + (2 * tm * D * 2) + (3 * tm * lp * 4) + (2 * tm * 4)
        return lp, need

    use_flash = bool(force_flash)
    TM = TM_pref
    TK = TM_pref
    Lp, need = _single_pass_plan(TM)
    if not use_flash and need > single_pass_budget_bytes:
        TM = 128
        Lp, need = _single_pass_plan(TM)
        if need > single_pass_budget_bytes:
            use_flash = True
    if use_flash:
        TM = TK = TM_pref            # flash fallback needs TM == TK
        Lp = _round_up(L, TM)

    padded = Lp != L
    n_row = Lp // TM

    # Pad the *gather indices* (repeat id 0) instead of jnp.pad-ing the gathered
    # arrays: the gather directly emits (Lp, D) with no extra HBM round-trip.
    idx = np.zeros((Lp,), dtype=np.int32)
    idx[:L] = overlap.astype(np.int32)
    idx = jnp.asarray(idx)

    # bf16 MXU operands (halves operand DMA); accumulation/LSE math stays f32.
    zi = jnp.asarray(source_user_emb)[idx].astype(jnp.bfloat16)
    zj = jnp.asarray(target_user_emb)[idx].astype(jnp.bfloat16)

    cparams = pltpu.CompilerParams(
        dimension_semantics=(("parallel",) if not use_flash
                             else ("parallel", "arbitrary")),
        vmem_limit_bytes=32 * 1024 * 1024)   # raise v5e's 16 MiB default scope

    if not use_flash:
        kernel = functools.partial(_uu_single_pass_kernel, L, padded)
        cost = pl.CostEstimate(
            flops=2 * Lp * Lp * D + 2 * Lp * D,
            transcendentals=Lp * Lp + Lp,          # EUP exp is the roofline
            bytes_accessed=2 * Lp * D * 2 + Lp * 4)
        per_row = pl.pallas_call(
            kernel,
            out_shape=jax.ShapeDtypeStruct((Lp, 1), jnp.float32),
            grid=(n_row,),
            in_specs=[
                pl.BlockSpec((TM, D), lambda i: (i, 0)),      # z_i row tile
                pl.BlockSpec((Lp, D), lambda i: (0, 0)),      # z_j resident
            ],
            out_specs=pl.BlockSpec((TM, 1), lambda i: (i, 0)),
            compiler_params=cparams,
            cost_estimate=cost,
        )(zi, zj)
    else:
        n_col = Lp // TK
        kernel = functools.partial(_uu_flash_kernel, L, padded)
        cost = pl.CostEstimate(
            flops=2 * Lp * Lp * D + 2 * Lp * D,
            transcendentals=Lp * Lp + Lp,
            bytes_accessed=(Lp * D + n_row * Lp * D) * 2 + Lp * 4)
        per_row = pl.pallas_call(
            kernel,
            out_shape=jax.ShapeDtypeStruct((Lp, 1), jnp.float32),
            grid=(n_row, n_col),
            in_specs=[
                pl.BlockSpec((TM, D), lambda i, k: (i, 0)),   # z_i row tile
                pl.BlockSpec((TK, D), lambda i, k: (k, 0)),   # z_j col tile
            ],
            out_specs=pl.BlockSpec((TM, 1), lambda i, k: (i, 0)),
            scratch_shapes=[pltpu.VMEM((TM, 1), jnp.float32),   # running max
                            pltpu.VMEM((TM, 1), jnp.float32),   # running sumexp
                            pltpu.VMEM((TM, 1), jnp.float32)],  # positives
            compiler_params=cparams,
            cost_estimate=cost,
        )(zi, zj)

    return jnp.sum(per_row) / jnp.float32(L)


class GraphContrastivePallas:
    """Mirror of the PyTorch GraphContrastive forward (u_u_cts path)."""

    def __init__(self, latent_dim, num_lapped_users, temp, cts_lamda, config):
        self.latent_dim = latent_dim
        self.num_lapped_users = num_lapped_users
        self.temp = temp            # unused by the u_u loss (matches PyTorch)
        self.cts_lamda = cts_lamda
        self.config = config
        # No learnable parameters (CrossEntropyLoss is parameter-free).

    def forward(self, source_user_all_embeddings, source_item_all_embeddings,
                target_user_all_embeddings, target_item_all_embeddings,
                batch_source_u, batch_source_i, batch_target_u, batch_target_i):
        # TODO(synk): the overlap-id unique runs on host (mirrors torch.unique);
        # in a real pipeline compute it in the input pipeline (or via
        # jnp.unique(size=...)) so forward() never blocks on device->host sync.
        bs_u = np.asarray(batch_source_u)
        bt_u = np.asarray(batch_target_u)
        overlap_user_id = np.unique(np.concatenate([
            bs_u[bs_u < self.num_lapped_users],
            bt_u[bt_u < self.num_lapped_users],
        ]))

        if self.config["u_u_cts"]:
            u_u_loss = u_u_cts_loss_pallas(source_user_all_embeddings,
                                           target_user_all_embeddings,
                                           overlap_user_id)
        else:
            u_u_loss = jnp.float32(0.0)

        # TODO(synk): u_i_cts / i_u_cts / i_i_cts require DGL neighbor and
        # negative sampling on bipartite graphs; config disables them here.
        return jnp.float32(self.cts_lamda) * u_u_loss


if __name__ == "__main__":
    key = jax.random.PRNGKey(0)
    k1, k2, k3, k4, k5, k6 = jax.random.split(key, 6)

    latent_dim = 32
    num_lapped_users = 16
    n_src_users, n_src_items = 24, 40
    n_tgt_users, n_tgt_items = 24, 40
    batch = 8

    source_user_emb = jax.random.normal(k1, (n_src_users, latent_dim), jnp.float32)
    source_item_emb = jax.random.normal(k2, (n_src_items, latent_dim), jnp.float32)
    target_user_emb = jax.random.normal(k3, (n_tgt_users, latent_dim), jnp.float32)
    target_item_emb = jax.random.normal(k4, (n_tgt_items, latent_dim), jnp.float32)

    batch_source_u = jax.random.randint(k5, (batch,), 0, n_src_users, jnp.int32)
    batch_target_u = jax.random.randint(k6, (batch,), 0, n_tgt_users, jnp.int32)
    batch_source_i = jnp.arange(batch, dtype=jnp.int32)
    batch_target_i = jnp.arange(batch, dtype=jnp.int32)

    config = {"u_u_cts": True, "u_i_cts": False, "i_u_cts": False,
              "i_i_cts": False, "num_neg_samples": 4, "seed": 0}

    cts_lamda = 0.5
    module = GraphContrastivePallas(latent_dim=latent_dim,
                                    num_lapped_users=num_lapped_users,
                                    temp=0.2, cts_lamda=cts_lamda, config=config)

    loss = module.forward(source_user_emb, source_item_emb,
                          target_user_emb, target_item_emb,
                          batch_source_u, batch_source_i,
                          batch_target_u, batch_target_i)
    loss = jax.block_until_ready(loss)

    # ---- pure numpy reference (bf16-rounded operands, f64 math) ------------
    bs_u = np.asarray(batch_source_u)
    bt_u = np.asarray(batch_target_u)
    ov = np.unique(np.concatenate([bs_u[bs_u < num_lapped_users],
                                   bt_u[bt_u < num_lapped_users]]))
    assert ov.size > 0
    zi = np.asarray(jnp.asarray(source_user_emb)[ov].astype(jnp.bfloat16)
                    .astype(jnp.float32), dtype=np.float64)
    zj = np.asarray(jnp.asarray(target_user_emb)[ov].astype(jnp.bfloat16)
                    .astype(jnp.float32), dtype=np.float64)
    S = zi @ zj.T
    m = S.max(axis=1)
    lse = m + np.log(np.sum(np.exp(S - m[:, None]), axis=1))
    ref_uu = float(np.mean(lse - np.diag(S)))

    assert np.allclose(float(loss), cts_lamda * ref_uu, rtol=5e-3, atol=5e-3), \
        (float(loss), cts_lamda * ref_uu)

    # Also exercise the flash (tiled online-logsumexp) fallback path once.
    loss_flash = jax.block_until_ready(
        u_u_cts_loss_pallas(source_user_emb, target_user_emb, ov,
                            force_flash=True))
    assert np.allclose(float(loss_flash), ref_uu, rtol=5e-3, atol=5e-3), \
        (float(loss_flash), ref_uu)

    print("KERNEL_OK")
</pallas_src>

<mosaic_0001>
module attributes {stable_mosaic.version = 11 : i64} {
  func.func @_uu_single_pass_kernel(%arg0: i32, %arg1: memref<16x32xbf16, #tpu.memory_space<vmem>>, %arg2: memref<16x32xbf16, #tpu.memory_space<vmem>>, %arg3: memref<16x1xf32, #tpu.memory_space<vmem>>) attributes {dimension_semantics = [#tpu.dimension_semantics<parallel>], iteration_bounds = array<i64: 1>, scalar_prefetch = 0 : i64, scratch_operands = 0 : i64, tpu.core_type = #tpu.core_type<tc>, window_params = [{transform_indices = @transform_0, window_bounds = array<i64: 16, 32>}, {pipeline_mode = #tpu.pipeline_mode<synchronous>, transform_indices = @transform_1, window_bounds = array<i64: 16, 32>}, {transform_indices = @transform_2, window_bounds = array<i64: 16, 1>}]} {
    %c0 = arith.constant 0 : index
    %c0_0 = arith.constant 0 : index
    %0 = vector.load %arg1[%c0, %c0_0] : memref<16x32xbf16, #tpu.memory_space<vmem>>, vector<16x32xbf16>
    %c0_1 = arith.constant 0 : index
    %c0_2 = arith.constant 0 : index
    %1 = vector.load %arg2[%c0_1, %c0_2] : memref<16x32xbf16, #tpu.memory_space<vmem>>, vector<16x32xbf16>
    %cst = arith.constant dense<0.000000e+00> : vector<16x16xf32>
    %2 = tpu.matmul %0, %1, %cst {dimension_numbers = #tpu.dot_dimension_numbers<[1], [1], [0], [0], [0, 0, 1, 0], [], []>} : vector<16x32xbf16>, vector<16x32xbf16>, vector<16x16xf32> -> vector<16x16xf32>
    %3 = tpu.iota {dimensions = array<i32: 1>} : vector<16x16xi32>
    %c9_i32 = arith.constant 9 : i32
    %4 = vector.broadcast %c9_i32 : i32 to vector<16x16xi32>
    %5 = arith.cmpi slt, %3, %4 : vector<16x16xi32>
    %cst_3 = arith.constant -1.000000e+30 : f32
    %6 = vector.broadcast %cst_3 : f32 to vector<16x16xf32>
    %7 = arith.select %5, %2, %6 : vector<16x16xi1>, vector<16x16xf32>
    %c16_i32 = arith.constant 16 : i32
    %8 = arith.muli %arg0, %c16_i32 : i32
    %9 = tpu.assume_multiple %8, 8 : i32
    %10 = arith.index_cast %9 : i32 to index
    %c0_4 = arith.constant 0 : index
    %11 = vector.load %arg2[%10, %c0_4] : memref<16x32xbf16, #tpu.memory_space<vmem>>, vector<16x32xbf16>
    %12 = arith.extf %0 : vector<16x32xbf16> to vector<16x32xf32>
    %13 = arith.extf %11 : vector<16x32xbf16> to vector<16x32xf32>
    %14 = arith.mulf %12, %13 : vector<16x32xf32>
    %cst_5 = arith.constant dense<0.000000e+00> : vector<16xf32>
    %15 = vector.multi_reduction <add>, %14, %cst_5 [1] : vector<16x32xf32> to vector<16xf32>
    %16 = vector.shape_cast %15 : vector<16xf32> to vector<16x1xf32>
    %cst_6 = arith.constant dense<0xFF800000> : vector<16xf32>
    %17 = vector.multi_reduction <maximumf>, %7, %cst_6 [1] : vector<16x16xf32> to vector<16xf32>
    %18 = vector.shape_cast %17 : vector<16xf32> to vector<16x1xf32>
    %19 = vector.broadcast %18 : vector<16x1xf32> to vector<16x16xf32>
    %20 = arith.subf %7, %19 : vector<16x16xf32>
    %21 = math.exp %20 : vector<16x16xf32>
    %cst_7 = arith.constant dense<0.000000e+00> : vector<16xf32>
    %22 = vector.multi_reduction <add>, %21, %cst_7 [1] : vector<16x16xf32> to vector<16xf32>
    %23 = vector.shape_cast %22 : vector<16xf32> to vector<16x1xf32>
    %24 = math.log %23 : vector<16x1xf32>
    %25 = arith.addf %18, %24 : vector<16x1xf32>
    %26 = arith.subf %25, %16 : vector<16x1xf32>
    %c16_i32_8 = arith.constant 16 : i32
    %27 = arith.muli %arg0, %c16_i32_8 : i32
    %28 = tpu.iota {dimensions = array<i32: 0>} : vector<16x1xi32>
    %29 = vector.broadcast %27 : i32 to vector<16x1xi32>
    %30 = arith.addi %29, %28 : vector<16x1xi32>
    %c9_i32_9 = arith.constant 9 : i32
    %31 = vector.broadcast %c9_i32_9 : i32 to vector<16x1xi32>
    %32 = arith.cmpi slt, %30, %31 : vector<16x1xi32>
    %cst_10 = arith.constant 0.000000e+00 : f32
    %33 = vector.broadcast %cst_10 : f32 to vector<16x1xf32>
    %34 = arith.select %32, %26, %33 : vector<16x1xi1>, vector<16x1xf32>
    %c0_11 = arith.constant 0 : index
    %c0_12 = arith.constant 0 : index
    %35 = vector.load %arg3[%c0_11, %c0_12] : memref<16x1xf32, #tpu.memory_space<vmem>>, vector<16x1xf32>
    tpu.vector_store %arg3[%c0_11, %c0_12], %34 {strides = array<i32>} : memref<16x1xf32, #tpu.memory_space<vmem>>, vector<16x1xf32>,
    return
  }
  func.func @transform_0(%arg0: i32) -> (i32, i32) {
    %c0_i32 = arith.constant 0 : i32
    %c0_i32_0 = arith.constant 0 : i32
    return %arg0, %c0_i32 : i32, i32
  }
  func.func @transform_1(%arg0: i32) -> (i32, i32) {
    %c0_i32 = arith.constant 0 : i32
    %c0_i32_0 = arith.constant 0 : i32
    %c0_i32_1 = arith.constant 0 : i32
    return %c0_i32, %c0_i32_0 : i32, i32
  }
  func.func @transform_2(%arg0: i32) -> (i32, i32) {
    %c0_i32 = arith.constant 0 : i32
    %c0_i32_0 = arith.constant 0 : i32
    return %arg0, %c0_i32 : i32, i32
  }
}

</mosaic_0001>

<bundles_post_ra>
// kernel: tpu_custom_call.1
= control target key start
LH: loop header
LB: loop body
LE: loop exit
PB: predicated region body
PF: predicated region fallthrough
CT: control target
= control target key end

     0   :  { %7 = vsyncpa [#allocation3], 0  ;;  %s269_s0 = inlined_call_operand.hbm [shape: bf16[16,32], index: 0, kind: input, shape index: {}]   ;;  %s270_s1 = inlined_call_operand.hbm [shape: bf16[16,32], index: 1, kind: input, shape index: {}]   ;;  %s271_s2 = inlined_call_operand.vmem [shape: f32[16,1], index: 2, kind: output, shape index: {}]  }
   0x1   :  { %s13_s11 = sshll.u32 %s269_s0, 4  ;;  %s14_s11 = int_to_ptr.hbm [resolvable:$true] %s13_s11 }
   0x2   :  { %8 = vsyncpa [#allocation5], 0  ;;  %s230_s12 = smov [#allocation2]   ;;  %s26_s16 = sshll.u32 %s270_s1, 4  ;;  %s27_s16 = int_to_ptr.hbm [resolvable:$true] %s26_s16 }
   0x3   :  { %s15_s13 = sshll.u32 %s230_s12, 4  ;;  %s231_s17 = smov 64   ;;  %s16_s13 = int_to_ptr.vmem [resolvable:$true] %s15_s13 }
   0x4   :  { %s232_s18 = smov 4   ;;  %s233_s19 = smov [#allocation4]  }
   0x5   :  { %21 = dma.hbm_to_vmem [thread:$0]  %s14_s11, 128, %s16_s13, [#allocation3], %s231_s17, %s231_s17, %s232_s18  }
   0x6   :  { %s28_s20 = sshll.u32 %s233_s19, 4  ;;  %s29_s20 = int_to_ptr.vmem [resolvable:$true] %s28_s20 }
   0x7   :  { %34 = dma.hbm_to_vmem [thread:$0]  %s27_s16, 128, %s29_s20, [#allocation5], %s231_s17, %s231_s17, %s232_s18  }
   0x8   :  { %226 = dma.done.wait [#allocation3], 128  }
   0x9   :  { %227 = vsyncadd [#allocation3], 4294967168 }
   0xa   :  { %228 = dma.done.wait [#allocation5], 128  }
   0xb   :  { %229 = vsyncadd [#allocation5], 4294967168  ;;  %vm58_vm0 = vcmask 261120   ;;  %v161_v0 = vld [vmem:[#allocation4] sm:$0xff]  ;;  %v160_v2 = vld [vmem:[#allocation2] sm:$0xff]  ;;  %v79_v4 = vlaneseq  ;;  %vm103_vm2 = vcmask 130048  }
   0xc   :  { %v63_v1 = vsel %vm58_vm0, %v161_v0, 0  ;;  %v45_v11 = vld [vmem:[#allocation2] sm:$0xff]   ;;  %v163_v12 = vld [vmem:[#allocation4] sm:$0xff]   ;;  %vm140_vm4 = vcmask 7168  }
   0xd   :  { %72 = vmatpush.bf16.xpose.msra.mxu0 %v63_v1  ;;  %v80_v5 = vand.u32 127, %v79_v4  ;;  %v165_v13 = vunpack.c.h.bf16 %v163_v12  ;;  %v92_v14 = vunpack.c.h.bf16 %v45_v11  ;;  %v164_v16 = vunpack.c.l.bf16 %v163_v12 }
   0xe   :  { %v91_v17 = vunpack.c.l.bf16 %v45_v11  ;;  %v131_v32 = vshrl.u32 %v79_v4, 7 }
   0xf   :  { %vm81_vm1 = vcmp.lt.s32.totalorder %v80_v5, 9  ;;  %v96_v15 = vmul.f32 %v165_v13, %v92_v14 }
  0x10   :  { %v95_v19 = vmul.f32 %v164_v16, %v91_v17  ;;  %v132_v34 = vadd.s32 8, %v131_v32 }
  0x11   :  { %v100_v18 = vsel %vm58_vm0, %v96_v15, 0.0 }
  0x12   :  { %101 = vadd.xlane.f32.xlu2 %v100_v18  ;;  %v97_v20 = vsel %vm58_vm0, %v95_v19, 0.0  ;;  %vm137_vm3 = vcmp.lt.s32.totalorder %v132_v34, 9 }
  0x14   :  { %159 = vmatmul.msk.bf16.vlgmr.msra.gmra.mxu0 %vm58_vm0, %v160_v2 }
  0x1a   :  { %98 = vadd.xlane.f32.xlu2 %v97_v20 }
  0x85   :  { %v102_v35 = vpop.xlane.xlu2 %101 }
  0x8d   :  { %v99_v43 = vpop.xlane.xlu2 %98 }
  0x91   :  { %v74_v3 = vpop.f32.mrf.mxu0 }
  0x92   :  { %v82_v9 = vsel %vm81_vm1, %v74_v3, -1e+30 }
  0x93   :  { %v104_v10 = vsel %vm103_vm2, %v82_v9, -inf }
  0x99   :  { %v76_v6 = vpop.f32.mrf.mxu0 }
  0x9a   :  { %v83_v7 = vsel %vm81_vm1, %v76_v6, -1e+30 }
  0x9b   :  { %v107_v8 = vsel %vm103_vm2, %v83_v7, -inf }
  0x9c   :  { %108 = vmax.xlane.f32.xlu0 %v107_v8 }
  0xa4   :  { %105 = vmax.xlane.f32.xlu0 %v104_v10 }
 0x10f   :  { %v109_v21 = vpop.xlane.xlu0 %108 }
 0x110   :  { %v111_v22 = vsub.f32 %v83_v7, %v109_v21 }
 0x112   :  { %v114_v23 = vmul.f32 1.442695, %v111_v22 }
 0x114   :  { %170 = vpow2.f32 %v114_v23 }
 0x117   :  { %v106_v24 = vpop.xlane.xlu0 %105 }
 0x118   :  { %v110_v25 = vsub.f32 %v82_v9, %v106_v24 }
 0x11a   :  { %v171_v26 = vpop.eup %170  ;;  %v112_v27 = vmul.f32 1.442695, %v110_v25 }
 0x11b   :  { %v119_v28 = vsel %vm103_vm2, %v171_v26, 0.0 }
 0x11c   :  { %172 = vpow2.f32 %v112_v27  ;;  %120 = vadd.xlane.f32.xlu1 %v119_v28 }
 0x122   :  { %v173_v29 = vpop.eup %172 }
 0x123   :  { %v116_v30 = vsel %vm103_vm2, %v173_v29, 0.0 }
 0x124   :  { %117 = vadd.xlane.f32.xlu1 %v116_v30 }
 0x18f   :  { %v121_v31 = vpop.xlane.xlu1 %120 }
 0x190   :  { %174 = vlog2.f32 %v121_v31 }
 0x196   :  { %v175_v33 = vpop.eup %174 }
 0x197   :  { %v125_v36 = vmul.f32 0.6931472, %v175_v33  ;;  %v118_v37 = vpop.xlane.xlu1 %117 }
 0x198   :  { %176 = vlog2.f32 %v118_v37 }
 0x199   :  { %v127_v38 = vadd.f32 %v125_v36, %v109_v21 }
 0x19b   :  { %v129_v39 = vsub.f32 %v127_v38, %v102_v35 }
 0x19d   :  { %v139_v40 = vsel %vm137_vm3, %v129_v39, 0.0 }
 0x19e   :  { %v177_v41 = vpop.eup %176  ;;  %142 = vst.msk [vmem:[%s271_s2 + $0x8] sm:$0xff] %vm140_vm4, %v139_v40 }
 0x19f   :  { %v123_v42 = vmul.f32 0.6931472, %v177_v41 }
 0x1a1   :  { %v126_v44 = vadd.f32 %v123_v42, %v106_v24 }
 0x1a3   :  { %v128_v45 = vsub.f32 %v126_v44, %v99_v43 }
 0x1a5   :  { %141 = vst.msk [vmem:[%s271_s2] sm:$0xff] %vm140_vm4, %v128_v45 }
 0x1a6   :  { %147 = vsyncpa [#allocation3], 1 }
 0x1a7   :  { %148 = vsyncpa [#allocation5], 1 }

</bundles_post_ra>
